<compile_context>
chip_gen: v6e
topology: v6e:2x2x1
jax: 0.10.0
libtpu: 0.0.40
codegen_flags: <defaults>
</compile_context>

<pallas_src>
import functools

import jax
import jax.numpy as jnp
from jax.experimental import pallas as pl
from jax.experimental.pallas import tpu as pltpu

_LANE = 128
_SUB = 8
_MAX_TILE_ROWS = 4096  # 4096*128*4B = 2 MiB per f32 buffer


def _cdiv(a, b):
    return -(-a // b)


def _focal_core(x, t, *, alpha, gamma):
    """Elementwise focal loss in f32 (matches torch's BCE-with-logits form)."""
    x = x.astype(jnp.float32)
    t = t.astype(jnp.float32)
    # Numerically-stable BCE with logits: max(x,0) - x*t + log1p(exp(-|x|))
    bce = jnp.maximum(x, 0.0) - x * t + jnp.log1p(jnp.exp(-jnp.abs(x)))
    pt = jnp.exp(-bce)
    alpha_t = alpha * t + (1.0 - alpha) * (1.0 - t)
    omp = 1.0 - pt
    if gamma == 0.0:
        w = jnp.ones_like(omp)
    elif gamma == 1.0:
        w = omp
    elif gamma == 2.0:
        w = omp * omp
    elif gamma == 3.0:
        w = omp * omp * omp
    else:
        w = jnp.power(omp, gamma)
    return alpha_t * w * bce


def _focal_partial_sum_kernel(x_ref, t_ref, out_ref, *, alpha, gamma,
                              n_valid, tile_rows):
    """Per-tile partial sums, reduced to a single (8,128) vreg per grid step."""
    i = pl.program_id(0)
    f = _focal_core(x_ref[...], t_ref[...], alpha=alpha, gamma=gamma)

    # Zero out padded / out-of-bounds elements (only the last tile has any,
    # but the iota+select is free VALU filler on a memory-bound kernel).
    row = jax.lax.broadcasted_iota(jnp.int32, f.shape, 0)
    lane = jax.lax.broadcasted_iota(jnp.int32, f.shape, 1)
    flat_idx = (i * tile_rows + row) * _LANE + lane
    f = jnp.where(flat_idx < n_valid, f, 0.0)

    # (tile_rows, 128) -> (tile_rows/8, 8, 128) is layout-preserving; summing
    # the leading axis is plain vreg adds (no per-iteration cross-lane XLU).
    out_ref[...] = f.reshape(tile_rows // _SUB, _SUB, _LANE).sum(axis=0)


def _focal_elementwise_kernel(x_ref, t_ref, o_ref, *, alpha, gamma):
    f = _focal_core(x_ref[...], t_ref[...], alpha=alpha, gamma=gamma)
    o_ref[...] = f.astype(o_ref.dtype)


def focal_loss_with_logits(inputs, targets, alpha=1.0, gamma=2.0,
                           reduction="mean"):
    """Forward pass of the PyTorch `focal_loss_with_logits` module."""
    assert inputs.shape == targets.shape
    orig_shape = inputs.shape
    n = 1
    for d in orig_shape:
        n *= d
    alpha = float(alpha)
    gamma = float(gamma)

    x_flat = inputs.reshape(-1)
    t_flat = targets.reshape(-1)

    rows_min = _cdiv(n, _LANE)
    if rows_min <= _MAX_TILE_ROWS:
        # Small input: pad (cheaply) to a multiple of 8*128 so the single
        # full-extent block is (8,128)-aligned.
        pad = (-n) % (_SUB * _LANE)
    else:
        # Large input: only pad if n is not lane-aligned (usually no copy).
        pad = (-n) % _LANE
    if pad:
        x_flat = jnp.pad(x_flat, (0, pad))
        t_flat = jnp.pad(t_flat, (0, pad))

    rows = (n + pad) // _LANE
    tile_rows = min(_MAX_TILE_ROWS, rows)  # always a multiple of 8 or == rows
    grid = _cdiv(rows, tile_rows)

    x2 = x_flat.reshape(rows, _LANE)
    t2 = t_flat.reshape(rows, _LANE)

    in_block = pl.BlockSpec((tile_rows, _LANE), lambda i: (i, 0))

    if reduction in ("mean", "sum"):
        kernel = functools.partial(
            _focal_partial_sum_kernel, alpha=alpha, gamma=gamma,
            n_valid=n, tile_rows=tile_rows)
        partials = pl.pallas_call(
            kernel,
            out_shape=jax.ShapeDtypeStruct((grid * _SUB, _LANE), jnp.float32),
            grid=(grid,),
            in_specs=[in_block, in_block],
            out_specs=pl.BlockSpec((_SUB, _LANE), lambda i: (i, 0)),
            compiler_params=pltpu.CompilerParams(
                dimension_semantics=("parallel",)),
        )(x2, t2)
        total = jnp.sum(partials)
        if reduction == "mean":
            total = total / jnp.float32(n)
        return total.astype(inputs.dtype)
    else:  # reduction == 'none'
        kernel = functools.partial(
            _focal_elementwise_kernel, alpha=alpha, gamma=gamma)
        out = pl.pallas_call(
            kernel,
            out_shape=jax.ShapeDtypeStruct((rows, _LANE), inputs.dtype),
            grid=(grid,),
            in_specs=[in_block, in_block],
            out_specs=in_block,
            compiler_params=pltpu.CompilerParams(
                dimension_semantics=("parallel",)),
        )(x2, t2)
        flat = out.reshape(-1)
        if pad:
            flat = flat[:n]
        return flat.reshape(orig_shape)


def _reference_focal(x, t, alpha, gamma):
    x = x.astype(jnp.float32)
    t = t.astype(jnp.float32)
    bce = jnp.maximum(x, 0.0) - x * t + jnp.log1p(jnp.exp(-jnp.abs(x)))
    pt = jnp.exp(-bce)
    alpha_t = alpha * t + (1.0 - alpha) * (1.0 - t)
    return alpha_t * (1.0 - pt) ** gamma * bce


if __name__ == "__main__":
    key = jax.random.PRNGKey(0)
    k1, k2, k3, k4 = jax.random.split(key, 4)

    # Lane-aligned NCHW case (segmentation/detection-style head).
    x = jax.random.normal(k1, (2, 4, 16, 16), dtype=jnp.float32)
    t = (jax.random.uniform(k2, (2, 4, 16, 16)) > 0.5).astype(jnp.float32)

    loss_mean = focal_loss_with_logits(x, t, alpha=1.0, gamma=2.0,
                                       reduction="mean")
    jax.block_until_ready(loss_mean)
    ref_mean = jnp.mean(_reference_focal(x, t, 1.0, 2.0))
    assert jnp.allclose(loss_mean, ref_mean, rtol=1e-5, atol=1e-6), (
        loss_mean, ref_mean)

    # reduction='none' path (output preserves input dtype / shape).
    loss_none = focal_loss_with_logits(x, t, alpha=0.25, gamma=2.0,
                                       reduction="none")
    jax.block_until_ready(loss_none)
    ref_none = _reference_focal(x, t, 0.25, 2.0)
    assert loss_none.shape == x.shape
    assert jnp.allclose(loss_none, ref_none, rtol=1e-5, atol=1e-6)

    # Ragged shape (n not a multiple of 128) exercises the in-kernel mask.
    xr = jax.random.normal(k3, (2, 3, 5, 7), dtype=jnp.float32)
    tr = (jax.random.uniform(k4, (2, 3, 5, 7)) > 0.5).astype(jnp.float32)
    loss_sum = focal_loss_with_logits(xr, tr, alpha=0.25, gamma=2.0,
                                      reduction="sum")
    jax.block_until_ready(loss_sum)
    ref_sum = jnp.sum(_reference_focal(xr, tr, 0.25, 2.0))
    assert jnp.allclose(loss_sum, ref_sum, rtol=1e-5, atol=1e-5), (
        loss_sum, ref_sum)

    print("KERNEL_OK")
</pallas_src>

<mosaic_0001>
module attributes {stable_mosaic.version = 11 : i64} {
  func.func @_focal_partial_sum_kernel(%arg0: i32, %arg1: memref<16x128xf32, #tpu.memory_space<vmem>>, %arg2: memref<16x128xf32, #tpu.memory_space<vmem>>, %arg3: memref<8x128xf32, #tpu.memory_space<vmem>>) attributes {dimension_semantics = [#tpu.dimension_semantics<parallel>], iteration_bounds = array<i64: 1>, scalar_prefetch = 0 : i64, scratch_operands = 0 : i64, tpu.core_type = #tpu.core_type<tc>, window_params = [{transform_indices = @transform_0, window_bounds = array<i64: 16, 128>}, {transform_indices = @transform_1, window_bounds = array<i64: 16, 128>}, {transform_indices = @transform_2, window_bounds = array<i64: 8, 128>}]} {
    %c0 = arith.constant 0 : index
    %c0_0 = arith.constant 0 : index
    %0 = vector.load %arg1[%c0, %c0_0] : memref<16x128xf32, #tpu.memory_space<vmem>>, vector<16x128xf32>
    %c0_1 = arith.constant 0 : index
    %c0_2 = arith.constant 0 : index
    %1 = vector.load %arg2[%c0_1, %c0_2] : memref<16x128xf32, #tpu.memory_space<vmem>>, vector<16x128xf32>
    %cst = arith.constant 0.000000e+00 : f32
    %2 = vector.broadcast %cst : f32 to vector<16x128xf32>
    %3 = arith.maximumf %0, %2 : vector<16x128xf32>
    %4 = arith.mulf %0, %1 : vector<16x128xf32>
    %5 = arith.subf %3, %4 : vector<16x128xf32>
    %6 = math.absf %0 : vector<16x128xf32>
    %cst_3 = arith.constant 0.000000e+00 : f32
    %7 = vector.broadcast %cst_3 : f32 to vector<16x128xf32>
    %8 = arith.subf %7, %6 : vector<16x128xf32>
    %9 = math.exp %8 : vector<16x128xf32>
    %10 = math.log1p %9 : vector<16x128xf32>
    %11 = arith.addf %5, %10 : vector<16x128xf32>
    %cst_4 = arith.constant 0.000000e+00 : f32
    %12 = vector.broadcast %cst_4 : f32 to vector<16x128xf32>
    %13 = arith.subf %12, %11 : vector<16x128xf32>
    %14 = math.exp %13 : vector<16x128xf32>
    %cst_5 = arith.constant 1.000000e+00 : f32
    %15 = vector.broadcast %cst_5 : f32 to vector<16x128xf32>
    %16 = arith.mulf %15, %1 : vector<16x128xf32>
    %cst_6 = arith.constant 1.000000e+00 : f32
    %17 = vector.broadcast %cst_6 : f32 to vector<16x128xf32>
    %18 = arith.subf %17, %1 : vector<16x128xf32>
    %cst_7 = arith.constant 0.000000e+00 : f32
    %19 = vector.broadcast %cst_7 : f32 to vector<16x128xf32>
    %20 = arith.mulf %19, %18 : vector<16x128xf32>
    %21 = arith.addf %16, %20 : vector<16x128xf32>
    %cst_8 = arith.constant 1.000000e+00 : f32
    %22 = vector.broadcast %cst_8 : f32 to vector<16x128xf32>
    %23 = arith.subf %22, %14 : vector<16x128xf32>
    %24 = arith.mulf %23, %23 : vector<16x128xf32>
    %25 = arith.mulf %21, %24 : vector<16x128xf32>
    %26 = arith.mulf %25, %11 : vector<16x128xf32>
    %27 = tpu.iota {dimensions = array<i32: 0>} : vector<16x128xi32>
    %28 = tpu.iota {dimensions = array<i32: 1>} : vector<16x128xi32>
    %c16_i32 = arith.constant 16 : i32
    %29 = arith.muli %arg0, %c16_i32 : i32
    %30 = vector.broadcast %29 : i32 to vector<16x128xi32>
    %31 = arith.addi %30, %27 : vector<16x128xi32>
    %c128_i32 = arith.constant 128 : i32
    %32 = vector.broadcast %c128_i32 : i32 to vector<16x128xi32>
    %33 = arith.muli %31, %32 : vector<16x128xi32>
    %34 = arith.addi %33, %28 : vector<16x128xi32>
    %c2048_i32 = arith.constant 2048 : i32
    %35 = vector.broadcast %c2048_i32 : i32 to vector<16x128xi32>
    %36 = arith.cmpi slt, %34, %35 : vector<16x128xi32>
    %cst_9 = arith.constant 0.000000e+00 : f32
    %37 = vector.broadcast %cst_9 : f32 to vector<16x128xf32>
    %38 = arith.select %36, %26, %37 : vector<16x128xi1>, vector<16x128xf32>
    %39 = vector.shape_cast %38 : vector<16x128xf32> to vector<2x8x128xf32>
    %cst_10 = arith.constant dense<0.000000e+00> : vector<8x128xf32>
    %40 = vector.multi_reduction <add>, %39, %cst_10 [0] : vector<2x8x128xf32> to vector<8x128xf32>
    %c0_11 = arith.constant 0 : index
    %c0_12 = arith.constant 0 : index
    %41 = vector.load %arg3[%c0_11, %c0_12] : memref<8x128xf32, #tpu.memory_space<vmem>>, vector<8x128xf32>
    tpu.vector_store %arg3[%c0_11, %c0_12], %40 {strides = array<i32>} : memref<8x128xf32, #tpu.memory_space<vmem>>, vector<8x128xf32>,
    return
  }
  func.func @transform_0(%arg0: i32) -> (i32, i32) {
    %c0_i32 = arith.constant 0 : i32
    %c0_i32_0 = arith.constant 0 : i32
    return %arg0, %c0_i32 : i32, i32
  }
  func.func @transform_1(%arg0: i32) -> (i32, i32) {
    %c0_i32 = arith.constant 0 : i32
    %c0_i32_0 = arith.constant 0 : i32
    return %arg0, %c0_i32 : i32, i32
  }
  func.func @transform_2(%arg0: i32) -> (i32, i32) {
    %c0_i32 = arith.constant 0 : i32
    %c0_i32_0 = arith.constant 0 : i32
    return %arg0, %c0_i32 : i32, i32
  }
}

</mosaic_0001>

<bundles_post_ra>
// kernel: tpu_custom_call.1
= control target key start
LH: loop header
LB: loop body
LE: loop exit
PB: predicated region body
PF: predicated region fallthrough
CT: control target
= control target key end

     0   :  { %7 = vsyncpa [#allocation3], 0  ;;  %s245_s0 = inlined_call_operand.hbm [shape: f32[16,128], index: 0, kind: input, shape index: {}]   ;;  %s246_s1 = inlined_call_operand.hbm [shape: f32[16,128], index: 1, kind: input, shape index: {}]   ;;  %s247_s2 = inlined_call_operand.hbm [shape: f32[8,128], index: 2, kind: output, shape index: {}]  }
   0x1   :  { %8 = vsyncpa [#allocation6], 0 }
   0x2   :  { %9 = vsyncpa [#allocation4], 0  ;;  %s216_s9 = smov [#allocation2]  }
   0x3   :  { %s15_s10 = sshll.u32 %s216_s9, 4  ;;  %s16_s10 = int_to_ptr.vmem [resolvable:$true] %s15_s10 }
   0x4   :  { %s158_s11 = scalar_lea.vmem %s16_s10, 256  ;;  %p163_p1 = scmp.lt.s32.totalorder %s16_s10, %s16_s10 }
   0x5   :  { %p159_p0 = scmp.ne.s32.totalorder %s16_s10, %s158_s11  ;;  %p164_p2 = scmp.lt.s32.totalorder %s158_s11, %s158_s11 }
   0x7   :  { %p165_p3 = por %p164_p2, %p163_p1 }
   0x9   :  { %p166_p4 = pnand %p165_p3, %p159_p0 }
   0xb   :  { %169 = shalt.err (!%p166_p4)
}
   0xc   :  { %s217_s12 = smov 128   ;;  %s218_s13 = smov 8  }
   0xd   :  { %21 = dma.hbm_to_vmem [thread:$0]  %s245_s0, 256, %s16_s10, [#allocation3], %s217_s12, %s217_s12, %s218_s13  }
   0xe   :  { %s219_s16 = smov [#allocation5]  }
   0xf   :  { %s27_s17 = sshll.u32 %s219_s16, 4  ;;  %s28_s17 = int_to_ptr.vmem [resolvable:$true] %s27_s17 }
  0x10   :  { %s178_s18 = scalar_lea.vmem %s28_s17, 256  ;;  %p183_p6 = scmp.lt.s32.totalorder %s28_s17, %s28_s17 }
  0x11   :  { %p179_p5 = scmp.ne.s32.totalorder %s28_s17, %s178_s18  ;;  %p184_p7 = scmp.lt.s32.totalorder %s178_s18, %s178_s18 }
  0x13   :  { %p185_p8 = por %p184_p7, %p183_p6 }
  0x15   :  { %p186_p9 = pnand %p185_p8, %p179_p5 }
  0x17   :  { %189 = shalt.err (!%p186_p9)
}
  0x18   :  { %33 = dma.hbm_to_vmem [thread:$0]  %s246_s1, 256, %s28_s17, [#allocation6], %s217_s12, %s217_s12, %s218_s13  }
  0x19   :  { %210 = dma.done.wait [#allocation3], 256  }
  0x1a   :  { %211 = vsyncadd [#allocation3], 4294967040 }
  0x1b   :  { %212 = dma.done.wait [#allocation6], 256  }
  0x1c   :  { %213 = vsyncadd [#allocation6], 4294967040  ;;  %v40_v0 = vld [vmem:[#allocation2] sm:$0xff]  ;;  %v41_v1 = vld [vmem:[#allocation2 + $0x8] sm:$0xff]  ;;  %v98_v40 = vlaneseq  ;;  %s220_s0 = smov [#allocation7]  }
  0x1d   :  { %v50_v2 = vand.u32 2147483647, %v40_v0  ;;  %v51_v3 = vand.u32 2147483647, %v41_v1  ;;  %v42_v14 = vld [vmem:[#allocation5] sm:$0xff]  ;;  %v43_v15 = vld [vmem:[#allocation5 + $0x8] sm:$0xff] }
  0x1e   :  { %v44_v17 = vmax.f32 %v40_v0, 0.0  ;;  %v46_v18 = vmul.f32 %v42_v14, %v40_v0  ;;  %v45_v21 = vmax.f32 %v41_v1, 0.0  ;;  %v47_v22 = vmul.f32 %v43_v15, %v41_v1  ;;  %s123_s1 = sshll.u32 %s220_s0, 4  ;;  %s124_s1 = int_to_ptr.vmem [resolvable:$true] %s123_s1 }
  0x1f   :  { %v52_v4 = vsub.f32 0.0, %v50_v2  ;;  %v53_v5 = vsub.f32 0.0, %v51_v3  ;;  %v99_v41 = vshrl.u32 %v98_v40, 7  ;;  %v84_v42 = vsub.f32 1.0, %v42_v14  ;;  %s190_s21 = scalar_lea.vmem %s124_s1, 128  ;;  %p195_p11 = scmp.lt.s32.totalorder %s124_s1, %s124_s1 }
  0x20   :  { %v48_v26 = vsub.f32 %v44_v17, %v46_v18  ;;  %v49_v29 = vsub.f32 %v45_v21, %v47_v22  ;;  %v85_v43 = vsub.f32 1.0, %v43_v15  ;;  %v102_v47 = vand.u32 127, %v98_v40  ;;  %p191_p10 = scmp.ne.s32.totalorder %s124_s1, %s190_s21  ;;  %p196_p12 = scmp.lt.s32.totalorder %s190_s21, %s190_s21 }
  0x21   :  { %v54_v6 = vmul.f32 1.442695, %v52_v4  ;;  %v56_v7 = vmul.f32 1.442695, %v53_v5  ;;  %v100_v44 = vadd.s32 8, %v99_v41  ;;  %v86_v45 = vmul.f32 0.0, %v84_v42 }
  0x22   :  { %v87_v46 = vmul.f32 0.0, %v85_v43  ;;  %v107_v48 = vmul.u32 128, %v99_v41  ;;  %p197_p13 = por %p196_p12, %p195_p11 }
  0x23   :  { %138 = vpow2.f32 %v54_v6  ;;  %v108_v49 = vmul.u32 128, %v100_v44  ;;  %v88_v52 = vadd.f32 %v86_v45, %v42_v14 }
  0x24   :  { %140 = vpow2.f32 %v56_v7  ;;  %v89_v54 = vadd.f32 %v87_v46, %v43_v15  ;;  %v109_v56 = vadd.s32 %v107_v48, %v102_v47  ;;  %p198_p0 = pnand %p197_p13, %p191_p10 }
  0x25   :  { %v110_v58 = vadd.s32 %v108_v49, %v102_v47 }
  0x26   :  { %vm111_vm2 = vcmp.lt.s32.totalorder %v109_v56, 2048 }
  0x27   :  { %vm112_vm3 = vcmp.lt.s32.totalorder %v110_v58, 2048 }
  0x30   :  { %v139_v8 = vpop.eup %138 }
  0x31   :  { %v141_v9 = vpop.eup %140  ;;  %v58_v10 = vadd.f32 1.0, %v139_v8  ;;  %v61_v12 = vmul.f32 -0.5, %v139_v8  ;;  %v64_v19 = vand.u32 2147483647, %v139_v8 }
  0x32   :  { %v67_v11 = vadd.f32 1.0, %v141_v9  ;;  %v70_v13 = vmul.f32 -0.5, %v141_v9  ;;  %v73_v23 = vand.u32 2147483647, %v141_v9 }
  0x33   :  { %142 = vlog2.f32 %v58_v10  ;;  %v62_v16 = vadd.f32 1.0, %v61_v12  ;;  %vm65_vm0 = vcmp.lt.f32.partialorder %v64_v19, 0.0004427343 }
  0x34   :  { %144 = vlog2.f32 %v67_v11  ;;  %v71_v20 = vadd.f32 1.0, %v70_v13  ;;  %vm74_vm1 = vcmp.lt.f32.partialorder %v73_v23, 0.0004427343 }
  0x35   :  { %v63_v24 = vmul.f32 %v139_v8, %v62_v16 }
  0x36   :  { %v72_v27 = vmul.f32 %v141_v9, %v71_v20 }
  0x40   :  { %v143_v25 = vpop.eup %142 }
  0x41   :  { %v145_v28 = vpop.eup %144  ;;  %v60_v30 = vmul.f32 0.6931472, %v143_v25 }
  0x42   :  { %v69_v31 = vmul.f32 0.6931472, %v145_v28 }
  0x43   :  { %v66_v32 = vsel %vm65_vm0, %v63_v24, %v60_v30 }
  0x44   :  { %v75_v33 = vsel %vm74_vm1, %v72_v27, %v69_v31  ;;  %v76_v34 = vadd.f32 %v66_v32, %v48_v26 }
  0x45   :  { %v77_v35 = vadd.f32 %v75_v33, %v49_v29 }
  0x46   :  { %v78_v36 = vsub.f32 0.0, %v76_v34 }
  0x47   :  { %v79_v37 = vsub.f32 0.0, %v77_v35 }
  0x48   :  { %v80_v38 = vmul.f32 1.442695, %v78_v36 }
  0x49   :  { %v82_v39 = vmul.f32 1.442695, %v79_v37 }
  0x4a   :  { %146 = vpow2.f32 %v80_v38 }
  0x4b   :  { %148 = vpow2.f32 %v82_v39 }
  0x57   :  { %v147_v50 = vpop.eup %146 }
  0x58   :  { %v149_v51 = vpop.eup %148  ;;  %v90_v53 = vsub.f32 1.0, %v147_v50 }
  0x59   :  { %v91_v55 = vsub.f32 1.0, %v149_v51 }
  0x5a   :  { %v92_v57 = vmul.f32 %v90_v53, %v90_v53 }
  0x5b   :  { %v93_v59 = vmul.f32 %v91_v55, %v91_v55 }
  0x5c   :  { %v94_v60 = vmul.f32 %v92_v57, %v88_v52 }
  0x5d   :  { %v95_v61 = vmul.f32 %v93_v59, %v89_v54 }
  0x5e   :  { %v96_v62 = vmul.f32 %v94_v60, %v76_v34 }
  0x5f   :  { %v97_v63 = vmul.f32 %v95_v61, %v77_v35 }
  0x60   :  { %v113_v0 = vsel %vm111_vm2, %v96_v62, 0.0 }
  0x61   :  { %v114_v1 = vsel %vm112_vm3, %v97_v63, 0.0 }
  0x62   :  { %v115_v2 = vadd.f32 %v114_v1, %v113_v0 }
  0x64   :  { %116 = vst [vmem:[#allocation7] sm:$0xff] %v115_v2 }
  0x65   :  { %201 = shalt.err (!%p198_p0)
}
  0x66   :  { %126 = dma.vmem_to_hbm [thread:$0]  %s124_s1, 128, %s247_s2, [#allocation4]  }
  0x67   :  { %214 = dma.done.wait [#allocation4], 128  }
  0x68   :  { %215 = vsyncadd [#allocation4], 4294967168 }
  0x69   :  { %130 = vsyncpa [#allocation3], 1 }
  0x6a   :  { %131 = vsyncpa [#allocation6], 1 }
  0x6b   :  { %132 = vsyncpa [#allocation4], 1 }

</bundles_post_ra>
